<compile_context>
chip_gen: v6e
topology: v6e:2x2x1
jax: 0.10.0
libtpu: 0.0.40
codegen_flags: <defaults>
</compile_context>

<pallas_src>
import functools

import jax
import jax.numpy as jnp
from jax.experimental import pallas as pl
from jax.experimental.pallas import tpu as pltpu


def _seq_conv_kernel(w_ref, x_ref, o_ref, *, S, C, Co):
    # w_ref : (Co, 3*C)       packed taps: columns [k*C:(k+1)*C] == weight[:, :, k]
    # x_ref : (S*C, HW_tile)  frames stacked along sublanes (frame t = rows t*C:(t+1)*C)
    # o_ref : (S, Co, HW_tile)
    w = w_ref[...]
    if S == 1:
        acc = jnp.dot(w[:, C:2 * C], x_ref[...], preferred_element_type=jnp.float32)
        o_ref[0] = acc.astype(o_ref.dtype)
        return
    # S is small and static -> unrolled Python loop (full scheduler visibility).
    for t in range(S):
        if t == 0:
            # taps k=1,2 on frames 0,1 (k=0 falls on the zero pad -> dropped)
            acc = jnp.dot(w[:, C:], x_ref[0:2 * C, :],
                          preferred_element_type=jnp.float32)
        elif t == S - 1:
            # taps k=0,1 on frames S-2, S-1
            acc = jnp.dot(w[:, :2 * C], x_ref[(S - 2) * C:S * C, :],
                          preferred_element_type=jnp.float32)
        else:
            # fused 3-tap matmul over the contiguous 3-frame window
            acc = jnp.dot(w, x_ref[(t - 1) * C:(t + 2) * C, :],
                          preferred_element_type=jnp.float32)
        o_ref[t] = acc.astype(o_ref.dtype)


def seq_expand_conv(x, weight, seq_length):
    """x: (B, C_in, H, W), weight: (C_out, C_in, 3). Returns (B, C_out, H, W)."""
    B, C, H, W = x.shape
    S = int(seq_length)
    assert B % S == 0, (B, S)
    N = B // S
    HW = H * W
    Co = weight.shape[0]

    LANE = 128
    itemsize = jnp.dtype(x.dtype).itemsize

    # Lane-dense spatial tile, sized so the double-buffered input+output blocks
    # stay well inside VMEM on every generation (incl. v7x's 64 MiB).
    vmem_budget = 16 * 1024 * 1024
    bytes_per_lane = 2 * (S * C + S * Co) * itemsize          # 2x: double buffering
    max_tile = max(LANE, (vmem_budget // bytes_per_lane) // LANE * LANE)
    max_tile = min(max_tile, 8192)                            # keep vreg pressure sane
    hw_pad = pl.cdiv(HW, LANE) * LANE
    hw_tile = min(hw_pad, max_tile)
    hw_pad = pl.cdiv(hw_pad, hw_tile) * hw_tile
    n_hw = hw_pad // hw_tile

    # Free relayout: (B, C, H, W) -> (N, S*C, HW).  No transposes, no time pad.
    xr = x.reshape(N, S * C, HW)
    if hw_pad != HW:
        # Only non-128-multiple spatial sizes pay this copy.
        xr = jnp.pad(xr, ((0, 0), (0, 0), (0, hw_pad - HW)))

    # Pack the 3 temporal taps along the contraction dim: (Co, 3*C), keeping
    # the activation dtype (bf16 stays bf16); f32 accumulation happens in-kernel.
    w_packed = jnp.transpose(weight, (0, 2, 1)).reshape(Co, 3 * C).astype(x.dtype)

    kernel = functools.partial(_seq_conv_kernel, S=S, C=C, Co=Co)

    out = pl.pallas_call(
        kernel,
        out_shape=jax.ShapeDtypeStruct((N, S, Co, hw_pad), x.dtype),
        grid_spec=pltpu.PrefetchScalarGridSpec(
            num_scalar_prefetch=0,
            grid=(N, n_hw),
            in_specs=[
                # tiny packed weight, same block every step
                pl.BlockSpec((Co, 3 * C), lambda n, h: (0, 0)),
                # whole sequence for one sample / spatial tile, read ONCE
                pl.BlockSpec((None, S * C, hw_tile), lambda n, h: (n, 0, h)),
            ],
            out_specs=pl.BlockSpec((None, S, Co, hw_tile), lambda n, h: (n, 0, 0, h)),
        ),
        compiler_params=pltpu.CompilerParams(
            dimension_semantics=("parallel", "parallel"),
            vmem_limit_bytes=64 * 1024 * 1024),
    )(w_packed, xr)

    if hw_pad != HW:
        out = out[..., :HW]
    # (N, S, Co, HW) -> (B, Co, H, W): free reshape.
    return out.reshape(B, Co, H, W)


def reference(x, weight, seq_length):
    """Pure-JAX reference of the PyTorch forward."""
    B, C, H, W = x.shape
    S = seq_length
    N = B // S
    Co = weight.shape[0]
    xr = x.reshape(N, S, C, H, W)
    xpad = jnp.pad(xr, ((0, 0), (1, 1), (0, 0), (0, 0), (0, 0)))
    out = jnp.zeros((N, S, Co, H, W), jnp.float32)
    for k in range(3):
        out = out + jnp.einsum('oc,ntchw->ntohw', weight[:, :, k],
                               xpad[:, k:k + S].astype(jnp.float32))
    return out.reshape(B, Co, H, W).astype(x.dtype)


if __name__ == "__main__":
    # Small shapes consistent with the module: B = N * seq_length
    seq_length = 4
    N = 2
    B = N * seq_length          # 8
    C_in, C_out = 4, 4
    H = W = 16

    key = jax.random.PRNGKey(0)
    kx, kw = jax.random.split(key)
    x = jax.random.normal(kx, (B, C_in, H, W), dtype=jnp.float32)

    # Deterministic Conv3d weight: PyTorch shape (C_out, C_in, 3, 1, 1) squeezed to (C_out, C_in, 3)
    fan_in = C_in * 3
    weight = (jax.random.uniform(kw, (C_out, C_in, 3, 1, 1), dtype=jnp.float32,
                                 minval=-1.0, maxval=1.0) / jnp.sqrt(fan_in))
    weight = weight[..., 0, 0]  # (C_out, C_in, 3)

    out = seq_expand_conv(x, weight, seq_length)
    out = jax.block_until_ready(out)

    ref = reference(x, weight, seq_length)
    assert out.shape == (B, C_out, H, W), out.shape
    assert jnp.allclose(out, ref, atol=1e-5, rtol=1e-5), float(jnp.max(jnp.abs(out - ref)))

    print("KERNEL_OK")
</pallas_src>

<mosaic_0001>
module attributes {stable_mosaic.version = 11 : i64} {
  func.func @_seq_conv_kernel(%arg0: i32, %arg1: i32, %arg2: memref<4x12xf32, #tpu.memory_space<vmem>>, %arg3: memref<1x16x256xf32, #tpu.memory_space<vmem>>, %arg4: memref<1x4x4x256xf32, #tpu.memory_space<vmem>>) attributes {dimension_semantics = [#tpu.dimension_semantics<parallel>, #tpu.dimension_semantics<parallel>], iteration_bounds = array<i64: 2, 1>, scalar_prefetch = 0 : i64, scratch_operands = 0 : i64, tpu.core_type = #tpu.core_type<tc>, window_params = [{pipeline_mode = #tpu.pipeline_mode<synchronous>, transform_indices = @transform_0, window_bounds = array<i64: 4, 12>}, {transform_indices = @transform_1, window_bounds = array<i64: 1, 16, 256>}, {transform_indices = @transform_2, window_bounds = array<i64: 1, 4, 4, 256>}]} {
    %c0 = arith.constant 0 : index
    %c0_0 = arith.constant 0 : index
    %0 = vector.load %arg2[%c0, %c0_0] : memref<4x12xf32, #tpu.memory_space<vmem>>, vector<4x12xf32>
    %1 = vector.extract_strided_slice %0 {offsets = [0, 4], sizes = [4, 8], strides = [1, 1]} : vector<4x12xf32> to vector<4x8xf32>
    %c0_1 = arith.constant 0 : index
    %c0_2 = arith.constant 0 : index
    %c0_3 = arith.constant 0 : index
    %2 = vector.load %arg3[%c0_1, %c0_2, %c0_3] : memref<1x16x256xf32, #tpu.memory_space<vmem>>, vector<1x8x256xf32>
    %3 = vector.shape_cast %2 : vector<1x8x256xf32> to vector<8x256xf32>
    %cst = arith.constant dense<0.000000e+00> : vector<4x256xf32>
    %4 = tpu.matmul %1, %3, %cst {dimension_numbers = #tpu.dot_dimension_numbers<[1], [0], [0], [1], [0, 0, 1, 1], [], []>} : vector<4x8xf32>, vector<8x256xf32>, vector<4x256xf32> -> vector<4x256xf32>
    %c0_4 = arith.constant 0 : index
    %c0_5 = arith.constant 0 : index
    %c0_6 = arith.constant 0 : index
    %c0_7 = arith.constant 0 : index
    %5 = vector.load %arg4[%c0_4, %c0_5, %c0_6, %c0_7] : memref<1x4x4x256xf32, #tpu.memory_space<vmem>>, vector<1x1x4x256xf32>
    %6 = vector.shape_cast %5 : vector<1x1x4x256xf32> to vector<4x256xf32>
    %7 = vector.shape_cast %4 : vector<4x256xf32> to vector<1x1x4x256xf32>
    tpu.vector_store %arg4[%c0_4, %c0_5, %c0_6, %c0_7], %7 {strides = array<i32>} : memref<1x4x4x256xf32, #tpu.memory_space<vmem>>, vector<1x1x4x256xf32>,
    %c0_8 = arith.constant 0 : index
    %c0_9 = arith.constant 0 : index
    %c0_10 = arith.constant 0 : index
    %8 = vector.load %arg3[%c0_8, %c0_9, %c0_10] : memref<1x16x256xf32, #tpu.memory_space<vmem>>, vector<1x12x256xf32>
    %9 = vector.shape_cast %8 : vector<1x12x256xf32> to vector<12x256xf32>
    %cst_11 = arith.constant dense<0.000000e+00> : vector<4x256xf32>
    %10 = tpu.matmul %0, %9, %cst_11 {dimension_numbers = #tpu.dot_dimension_numbers<[1], [0], [0], [1], [0, 0, 1, 1], [], []>} : vector<4x12xf32>, vector<12x256xf32>, vector<4x256xf32> -> vector<4x256xf32>
    %c0_12 = arith.constant 0 : index
    %c1 = arith.constant 1 : index
    %c0_13 = arith.constant 0 : index
    %c0_14 = arith.constant 0 : index
    %11 = vector.load %arg4[%c0_12, %c1, %c0_13, %c0_14] : memref<1x4x4x256xf32, #tpu.memory_space<vmem>>, vector<1x1x4x256xf32>
    %12 = vector.shape_cast %11 : vector<1x1x4x256xf32> to vector<4x256xf32>
    %13 = vector.shape_cast %10 : vector<4x256xf32> to vector<1x1x4x256xf32>
    tpu.vector_store %arg4[%c0_12, %c1, %c0_13, %c0_14], %13 {strides = array<i32>} : memref<1x4x4x256xf32, #tpu.memory_space<vmem>>, vector<1x1x4x256xf32>,
    %c0_15 = arith.constant 0 : index
    %c4 = arith.constant 4 : index
    %c0_16 = arith.constant 0 : index
    %14 = vector.load %arg3[%c0_15, %c4, %c0_16] : memref<1x16x256xf32, #tpu.memory_space<vmem>>, vector<1x12x256xf32>
    %15 = vector.shape_cast %14 : vector<1x12x256xf32> to vector<12x256xf32>
    %cst_17 = arith.constant dense<0.000000e+00> : vector<4x256xf32>
    %16 = tpu.matmul %0, %15, %cst_17 {dimension_numbers = #tpu.dot_dimension_numbers<[1], [0], [0], [1], [0, 0, 1, 1], [], []>} : vector<4x12xf32>, vector<12x256xf32>, vector<4x256xf32> -> vector<4x256xf32>
    %c0_18 = arith.constant 0 : index
    %c2 = arith.constant 2 : index
    %c0_19 = arith.constant 0 : index
    %c0_20 = arith.constant 0 : index
    %17 = vector.load %arg4[%c0_18, %c2, %c0_19, %c0_20] : memref<1x4x4x256xf32, #tpu.memory_space<vmem>>, vector<1x1x4x256xf32>
    %18 = vector.shape_cast %17 : vector<1x1x4x256xf32> to vector<4x256xf32>
    %19 = vector.shape_cast %16 : vector<4x256xf32> to vector<1x1x4x256xf32>
    tpu.vector_store %arg4[%c0_18, %c2, %c0_19, %c0_20], %19 {strides = array<i32>} : memref<1x4x4x256xf32, #tpu.memory_space<vmem>>, vector<1x1x4x256xf32>,
    %20 = vector.extract_strided_slice %0 {offsets = [0, 0], sizes = [4, 8], strides = [1, 1]} : vector<4x12xf32> to vector<4x8xf32>
    %c0_21 = arith.constant 0 : index
    %c8 = arith.constant 8 : index
    %c0_22 = arith.constant 0 : index
    %21 = vector.load %arg3[%c0_21, %c8, %c0_22] : memref<1x16x256xf32, #tpu.memory_space<vmem>>, vector<1x8x256xf32>
    %22 = vector.shape_cast %21 : vector<1x8x256xf32> to vector<8x256xf32>
    %cst_23 = arith.constant dense<0.000000e+00> : vector<4x256xf32>
    %23 = tpu.matmul %20, %22, %cst_23 {dimension_numbers = #tpu.dot_dimension_numbers<[1], [0], [0], [1], [0, 0, 1, 1], [], []>} : vector<4x8xf32>, vector<8x256xf32>, vector<4x256xf32> -> vector<4x256xf32>
    %c0_24 = arith.constant 0 : index
    %c3 = arith.constant 3 : index
    %c0_25 = arith.constant 0 : index
    %c0_26 = arith.constant 0 : index
    %24 = vector.load %arg4[%c0_24, %c3, %c0_25, %c0_26] : memref<1x4x4x256xf32, #tpu.memory_space<vmem>>, vector<1x1x4x256xf32>
    %25 = vector.shape_cast %24 : vector<1x1x4x256xf32> to vector<4x256xf32>
    %26 = vector.shape_cast %23 : vector<4x256xf32> to vector<1x1x4x256xf32>
    tpu.vector_store %arg4[%c0_24, %c3, %c0_25, %c0_26], %26 {strides = array<i32>} : memref<1x4x4x256xf32, #tpu.memory_space<vmem>>, vector<1x1x4x256xf32>,
    return
  }
  func.func @transform_0(%arg0: i32, %arg1: i32) -> (i32, i32) {
    %c0_i32 = arith.constant 0 : i32
    %c0_i32_0 = arith.constant 0 : i32
    %c0_i32_1 = arith.constant 0 : i32
    return %c0_i32, %c0_i32_0 : i32, i32
  }
  func.func @transform_1(%arg0: i32, %arg1: i32) -> (i32, i32, i32) {
    %c0_i32 = arith.constant 0 : i32
    %c0_i32_0 = arith.constant 0 : i32
    return %arg0, %c0_i32, %arg1 : i32, i32, i32
  }
  func.func @transform_2(%arg0: i32, %arg1: i32) -> (i32, i32, i32, i32) {
    %c0_i32 = arith.constant 0 : i32
    %c0_i32_0 = arith.constant 0 : i32
    %c0_i32_1 = arith.constant 0 : i32
    return %arg0, %c0_i32, %c0_i32_0, %arg1 : i32, i32, i32, i32
  }
}

</mosaic_0001>

<bundles_post_ra>
// kernel: tpu_custom_call.1
= control target key start
LH: loop header
LB: loop body
LE: loop exit
PB: predicated region body
PF: predicated region fallthrough
CT: control target
= control target key end

     0   :  { %7 = vsyncpa [#allocation3], 0  ;;  %s1136_s0 = inlined_call_operand.hbm [shape: f32[4,12], index: 0, kind: input, shape index: {}]   ;;  %s1137_s1 = inlined_call_operand.hbm [shape: f32[2,16,256], index: 1, kind: input, shape index: {}]   ;;  %s1138_s2 = inlined_call_operand.hbm [shape: f32[2,4,4,256], index: 2, kind: output, shape index: {}]  }
   0x1   :  { %8 = vsyncpa [#allocation6], 0 }
   0x2   :  { %10 = vsyncpa [#allocation6 + $0x1], 0 }
   0x3   :  { %11 = vsyncpa [#allocation4], 0 }
   0x4   :  { %13 = vsyncpa [#allocation4 + $0x1], 0  ;;  %s937_s9 = smov 0   ;;  %s939_s10 = smov 0  }
   0x5   :  { %s941_s11 = smov 0   ;;  %s943_s12 = smov 0  }
   0x6   :  { %s945_s13 = smov 0   ;;  %s947_s14 = smov 0  }
   0x7 LB: > { %s664_s15 = sadd.s32 4294967295, %s911_s14   ;;  %s665_s16 = sadd.s32 4294967294, %s911_s14   ;;  %s911_s14 = sphi %s947_s14, %s19_s14   ;;  %s907_s13 = sphi %s945_s13, %s1157_s13   ;;  %s903_s12 = sphi %s943_s12, %s1156_s12   ;;  %s899_s11 = sphi %s941_s11, %s1155_s11   ;;  %s895_s10 = sphi %s939_s10, %s1154_s10   ;;  %s891_s9 = sphi %s937_s9, %s1153_s9  }
   0x8   : > { %s61_s17 = sadd.s32 1, %s899_s11  ;;  %p68_p0 = scmp.ne.s32.totalorder %s899_s11, %s895_s10 }
   0x9   : > { %p69_p1 = scmp.eq.s32.totalorder %s911_s14, 0  ;;  %p74_p2 = scmp.ne.s32.totalorder %s895_s10, %s891_s9 }
   0xa   : > { %p975_p3 = scmp.eq.s32.totalorder %s664_s15, 0  ;;  %p100_p4 = scmp.eq.s32.totalorder %s664_s15, 1 }
   0xb   : > { %p979_p5 = por %p69_p1, %p68_p0  ;;  %p106_p6 = scmp.eq.s32.totalorder %s665_s16, 1 }
   0xc   : > { %p985_p7 = por %p975_p3, %p74_p2  ;;  %p989_p8 = por %p100_p4, %p68_p0 }
   0xd   : > { %p993_p9 = por %p106_p6, %p74_p2  ;;  %p666_p10 = scmp.ge.s32.totalorder %s911_s14, 1 }
   0xe   : > { %s1143_s20 = scalar_select %p985_p7, 1, 0 }
   0xf   : > { %s1144_s21 = scalar_select %p989_p8, 1, 0 }
  0x10   : > { %s1145_s22 = scalar_select %p993_p9, 1, 0 }
  0x11   : > { %p113_p11 = scmp.lt.s32.totalorder %s911_s14, 3  ;;  %s913_s24 = smov [#allocation2]  }
  0x12   : > { %s126_s25 = sshll.u32 %s913_s24, 4  ;;  %p715_p1 = scmp.lt.s32.totalorder %s911_s14, 2  ;;  %s127_s25 = int_to_ptr.vmem [resolvable:$true] %s126_s25 }
  0x13   : > { %p1000_p13 = pnand %p666_p10, %p113_p11  ;;  %s31_s28 = sadd.s32 1, %s907_s13 }
  0x14   : > { %p1009_p4 = pnand %p715_p1, %p979_p5  ;;  %p33_p6 = scmp.ge.s32.totalorder %s31_s28, 2 }
  0x15   : > { %p702_p0 = pneg %p1000_p13  ;;  %s137_s29 = sand.u32 1, %s899_s11  }
  0x16   : > { %s784_s30 = scalar_lea.vmem %s127_s25, 64  ;;  %p792_p8 = scmp.lt.s32.totalorder %s127_s25, %s127_s25 }
  0x17   : > { %p1015_p2 = pnand %p702_p0, %p975_p3  ;;  %p785_p11 = scmp.ne.s32.totalorder %s127_s25, %s784_s30 }
  0x18   : > { %p793_p5 = scmp.lt.s32.totalorder %s784_s30, %s784_s30 }
  0x19   : > { %p775_p10 = pneg %p1015_p2 }
  0x1a   : > { %p794_p1 = por %p793_p5, %p792_p8 }
  0x1b   : > { %p787_p12 = pnand %p785_p11, %p775_p10 }
  0x1d   : > { %p788_p9 = pneg %p787_p12 }
  0x1f   : > { %p795_p7 = pnand %p794_p1, %p788_p9 }
  0x21   : > { %798 = shalt.err (!%p795_p7)
}
  0x22   : > { %705 = dma.hbm_to_vmem [thread:$0]  (!%p1015_p2), %s1136_s0, 64, %s127_s25, [#allocation3]  }
  0x23   : > { %s1159_s28 = smov (%p33_p6, %s31_s28), 0  ;;  %s669_s5 = sshll.u32 %s137_s29, 5 }
  0x24   : > { %s56_s6 = ssub.s32 %s907_s13, %s1159_s28  ;;  %s692_s7 = sshll.u32 %s907_s13, 9 }
  0x25   : > { %p59_p12 = scmp.eq.s32.totalorder %s56_s6, 0  ;;  %s149_s16 = scalar_lea.hbm %s1137_s1, %s692_s7 }
  0x26   : > { %s141_s19 = scalar_lea.vmem [#allocation5], %s669_s5  ;;  %s138_s30 = scalar_lea.sflag [#allocation6], %s137_s29 }
  0x27   : > { %s150_s24 = sshll.u32 %s141_s19, 4  ;;  %p801_p7 = pneg %p1009_p4  ;;  %s151_s24 = int_to_ptr.vmem [resolvable:$true] %s150_s24 }
  0x28   : > { %s1039_s27 = scalar_select %p59_p12, %s899_s11, %s61_s17  }
  0x29   : > { %s812_s25 = scalar_lea.vmem %s151_s24, 512  ;;  %s914_s3 = smov [#allocation5]  }
  0x2a   : > { %p813_p8 = scmp.ne.s32.totalorder %s151_s24, %s812_s25  ;;  %s817_s4 = sshll.u32 %s914_s3, 4  ;;  %s818_s4 = int_to_ptr.vmem [resolvable:$false] %s817_s4 }
  0x2b   : > { %s819_s6 = scalar_lea.vmem %s818_s4, 1024  ;;  %p820_p2 = scmp.lt.s32.totalorder %s151_s24, %s818_s4 }
  0x2c   : > { %p815_p9 = pnand %p813_p8, %p801_p7  ;;  %p821_p6 = scmp.lt.s32.totalorder %s819_s6, %s812_s25 }
  0x2e   : > { %p816_p0 = pneg %p815_p9  ;;  %p822_p10 = por %p821_p6, %p820_p2 }
  0x30   : > { %p823_p11 = pnand %p822_p10, %p816_p0 }
  0x32   : > { %826 = shalt.err (!%p823_p11)
}
  0x33   : > { %s915_s5 = smov 256   ;;  %s916_s17 = smov 16  }
  0x34   : > { %709 = dma.hbm_to_vmem [thread:$0]  (!%p1009_p4), %s149_s16, 512, %s151_s24, %s138_s30, %s915_s5, %s915_s5, %s916_s17  }
  0x35   : > { %162 = sbr.rel (%p1000_p13) target bundleno = 395 (0x18b), region = 28 }
  0x3a   : > { %878 = dma.done.wait (%p975_p3), [#allocation3], 64  }
  0x3b   : > { %880 = vsyncadd (%p975_p3), [#allocation3], 4294967232  ;;  %s1052_s29 = sand.u32 1, %s895_s10   ;;  %p1149_p4 = scmp.ne.s32.totalorder %s1143_s20, 0 }
  0x3c   : > { %s674_s7 = sshll.u32 %s1052_s29, 5  ;;  %s169_s8 = scalar_lea.sflag [#allocation6], %s1052_s29 }
  0x3d   : > { %s1058_s26 = scalar_lea.vmem [#allocation5], %s674_s7 }
  0x3e   : > { %882 = dma.done.wait (%p1149_p4), %s169_s8, 512  }
  0x3f   : > { %884 = vsyncadd (%p1149_p4), %s169_s8, 4294966784  ;;  %v917_v0 = vmov 0.0   ;;  %vm287_vm0 = vcmask 1043456   ;;  %v195_v1 = vld [vmem:[#allocation2] sm:$0xf]  ;;  %s918_s18 = smov 124  }
  0x40   : > { %358 = vmatprep.mubr.f32.mxu1 %v917_v0  ;;  %268 = vmatprep.mubr.f32.mxu0 %v917_v0  ;;  %v283_v2 = vld [vmem:[%s1058_s26 + $0x18] sm:$0xf]  ;;  %v282_v3 = vld [vmem:[%s1058_s26 + $0x10] sm:$0xf]  ;;  %v281_v4 = vld [vmem:[%s1058_s26 + $0x8] sm:$0xff]  ;;  %vm284_vm1 = vcmask 97280  }
  0x41   : > { %199 = vrot.lane.b32.xlu0 %v195_v1, %s918_s18  ;;  %677 = vmatprep.subr.msk.mxu1 %vm287_vm0, %v283_v2  ;;  %v280_v5 = vld [vmem:[%s1058_s26] sm:$0xff]  ;;  %v374_v6 = vld [vmem:[%s1058_s26 + $0x18] sm:$0xff]  ;;  %v373_v8 = vld [vmem:[%s1058_s26 + $0x10] sm:$0xff]  ;;  %vm201_vm2 = vcmask 64512   ;;  %s192_s20 = scalar_lea.vmem [#allocation7], %s674_s7  ;;  %s693_s15 = sshll.u32 %s903_s12, 9 }
  0x42   : > { %678 = vmatpush1.msk.msra.mxu1 %vm287_vm0, %v282_v3  ;;  %234 = vmatprep.subr.mxu0 %v281_v4  ;;  %v383_v7 = vrot.slane %v374_v6, 4  ;;  %v372_v9 = vld [vmem:[%s1058_s26 + $0x8] sm:$0xf0]  ;;  %v371_v10 = vld [vmem:[%s1058_s26] sm:$0xf0]  ;;  %v380_v12 = vrot.slane %v373_v8, 4  ;;  %s1088_s24 = scalar_lea.hbm %s1138_s2, %s693_s15 }
  0x43   : > { %324 = vmatprep.subr.mxu1 %v281_v4  ;;  %235 = vmatpush1.msra.mxu0 %v280_v5  ;;  %v382_v11 = vrot.slane %v372_v9, 4  ;;  %v379_v13 = vrot.slane %v371_v10, 4  ;;  %s565_s23 = sshll.u32 %s192_s20, 4  ;;  %s550_s30 = scalar_lea.sflag [#allocation4], %s1052_s29  ;;  %s1083_s23 = int_to_ptr.vmem [resolvable:$true] %s565_s23 }
  0x44   : > { %325 = vmatpush1.msra.mxu1 %v280_v5  ;;  %681 = vmatprep.subr.msk.mxu0 %vm287_vm0, %v383_v7  ;;  %s827_s25 = scalar_lea.vmem %s1083_s23, 512  ;;  %p1150_p13 = scmp.ne.s32.totalorder %s1144_s21, 0 }
  0x45   : > { %679 = vmatmul.mubr.msk.f32.vlgmr.msra.gmra.mxu1 %vm284_vm1, %v195_v1  ;;  %502 = vmatprep.subr.mxu1 %v374_v6  ;;  %v384_v15 = vsel %vm287_vm0, %v382_v11, %v383_v7  ;;  %v381_v16 = vsel %vm287_vm0, %v379_v13, %v380_v12  ;;  %p828_p3 = scmp.ne.s32.totalorder %s1083_s23, %s827_s25  ;;  %s919_s12 = smov [#allocation7]  }
  0x46   : > { %503 = vmatpush1.msra.mxu1 %v373_v8  ;;  %536 = vmatprep.mubr.f32.mxu1 %v917_v0  ;;  %s831_s3 = sshll.u32 %s919_s12, 4  ;;  %s832_s3 = int_to_ptr.vmem [resolvable:$false] %s831_s3 }
  0x47   : > { %p829_p5 = pnand %p828_p3, %p1150_p13  ;;  %s833_s4 = scalar_lea.vmem %s832_s3, 1024 }
  0x48   : > { %p834_p12 = scmp.lt.s32.totalorder %s1083_s23, %s832_s3  ;;  %p835_p7 = scmp.lt.s32.totalorder %s833_s4, %s827_s25 }
  0x49   : > { %685 = vmatmul.mubr.msk.f32.vlgmr.msra.gmra.mxu1 %vm201_vm2, %v195_v1  ;;  %p830_p1 = pneg %p829_p5 }
  0x4a   : > { %p836_p8 = por %p835_p7, %p834_p12 }
  0x4c   : > { %p837_p9 = pnand %p836_p8, %p830_p1 }
  0xb3   : > { %v200_v14 = vpop.permute.xlu0 %199 }
  0xb4   : > { %676 = vmatmul.mubr.msk.f32.vlgmr.msra.gmra.mxu0 %vm201_vm2, %v200_v14 }
  0xb5   : > { %682 = vmatpush1.msk.msra.mxu0 %vm287_vm0, %v380_v12  ;;  %455 = vmatprep.mubr.f32.mxu0 %v917_v0 }
  0xb6   : > { %421 = vmatprep.subr.mxu0 %v384_v15 }
  0xb7   : > { %422 = vmatpush1.msra.mxu0 %v381_v16 }
  0xb8   : > { %683 = vmatmul.mubr.msk.f32.vlgmr.msra.gmra.mxu0 %vm284_vm1, %v195_v1 }
 0x105   : > { %v360_v17 = vpop.f32.mrf.mxu1 }
 0x107   : > { %v362_v18 = vpop.f32.mrf.mxu1 }
 0x108   : > { %v367_v19 = vcombine.low %v360_v17, %v362_v18 }
 0x109   : > { %v538_v20 = vpop.f32.mrf.mxu1 }
 0x10a   : > { %680 = vst [vmem:[%s192_s20 + $0x8] sm:$0xff] %v367_v19 }
 0x10b   : > { %v540_v21 = vpop.f32.mrf.mxu1 }
 0x10c   : > { %v545_v22 = vcombine.low %v538_v20, %v540_v21 }
 0x10e   : > { %686 = vst [vmem:[%s192_s20 + $0x18] sm:$0xff] %v545_v22 }
 0x174   : > { %v270_v23 = vpop.f32.mrf.mxu0 }
 0x176   : > { %v272_v24 = vpop.f32.mrf.mxu0 }
 0x177   : > { %v277_v25 = vcombine.low %v270_v23, %v272_v24 }
 0x178   : > { %v457_v26 = vpop.f32.mrf.mxu0 }
 0x179   : > { %279 = vst [vmem:[%s192_s20] sm:$0xff] %v277_v25 }
 0x17a   : > { %v459_v27 = vpop.f32.mrf.mxu0 }
 0x17b   : > { %v464_v28 = vcombine.low %v457_v26, %v459_v27 }
 0x17d   : > { %684 = vst [vmem:[%s192_s20 + $0x10] sm:$0xff] %v464_v28 }
 0x17e   : > { %840 = shalt.err (!%p837_p9)
}
 0x17f   : > { %s841_s6 = scalar_lea.hbm %s1088_s24, 512  ;;  %s845_s7 = scalar_lea.hbm %s1138_s2, 1024 }
 0x180   : > { %p842_p0 = scmp.ne.s32.totalorder %s1088_s24, %s841_s6  ;;  %p846_p10 = scmp.lt.s32.totalorder %s1088_s24, %s1138_s2 }
 0x181   : > { %p847_p11 = scmp.lt.s32.totalorder %s845_s7, %s841_s6 }
 0x182   : > { %p843_p2 = pnand %p842_p0, %p1150_p13 }
 0x183   : > { %p848_p4 = por %p847_p11, %p846_p10 }
 0x184   : > { %p844_p6 = pneg %p843_p2 }
 0x186   : > { %p849_p3 = pnand %p848_p4, %p844_p6 }
 0x188   : > { %852 = shalt.err (!%p849_p3)
}
 0x189   : > { %s920_s18 = smov 128   ;;  %s921_s20 = smov 8  }
 0x18a   : > { %700 = dma.vmem_to_hbm [thread:$0]  (%p1150_p13), %s1083_s23, 512, %s1088_s24, %s550_s30, %s920_s18, %s920_s18, %s921_s20  }
 0x18b PF: > { %s580_s15 = sand.u32 1, %s891_s9   ;;  %p1151_p5 = scmp.ne.s32.totalorder %s1145_s22, 0 }
 0x18c   : > { %p1152_p1 = scmp.ge.s32.totalorder %s911_s14, 2  ;;  %s581_s16 = scalar_lea.sflag [#allocation4], %s580_s15 }
 0x18e   : > { %p711_p12 = pnand %p1152_p1, %p1151_p5 }
 0x190   : > { %p712_p7 = pneg %p711_p12 }
 0x192   : > { %886 = dma.done.wait (%p712_p7), %s581_s16, 512  }
 0x193   : > { %888 = vsyncadd (%p712_p7), %s581_s16, 4294966784  ;;  %s19_s14 = sadd.s32 1, %s911_s14   ;;  %s1153_s9 = smov %s895_s10 }
 0x194   : > { %p16_p8 = scmp.ge.s32.totalorder %s19_s14, 4   ;;  %s1154_s10 = smov %s899_s11 }
 0x195   : > { %s1155_s11 = smov %s1039_s27  ;;  %s1156_s12 = smov %s907_s13 }
 0x196   : > { %s1157_s13 = smov %s1159_s28  ;;  %18 = sbr.rel (!%p16_p8) target bundleno = 7 (0x7), region = 81 }
 0x19b   :  { %586 = vsyncpa [#allocation3], 1 }
 0x19c   :  { %588 = vsyncpa [#allocation3 + $0x1], 1 }
 0x19d   :  { %589 = vsyncpa [#allocation6], 1 }
 0x19e   :  { %591 = vsyncpa [#allocation6 + $0x1], 1 }
 0x19f   :  { %592 = vsyncpa [#allocation4], 1 }
 0x1a0   :  { %594 = vsyncpa [#allocation4 + $0x1], 1 }

</bundles_post_ra>
